<compile_context>
chip_gen: v5e
topology: v5e:2x2
jax: 0.10.0
libtpu: 0.0.40
codegen_flags: <defaults>
</compile_context>

<pallas_src>
import functools

import jax
import jax.numpy as jnp
from jax import lax
from jax.experimental import pallas as pl
from jax.experimental.pallas import tpu as pltpu


def _round_up(x: int, m: int) -> int:
    return (x + m - 1) // m * m


# Conservative budgets that are legal on every generation (v7x: 64 MiB VMEM).
_TILE_VMEM_BUDGET = 40 * 1024 * 1024
_VMEM_LIMIT_BYTES = 48 * 1024 * 1024


def _tile_vmem_bytes(tm: int, n_pad: int) -> int:
    # 2 f32 inputs + 1 f32 output, double-buffered, plus the resident f32 mask
    # (also counted double-buffered to stay conservative).
    io = (2 * 2 + 2) * tm * n_pad * 4
    mask = 2 * n_pad * n_pad * 4
    return io + mask


def _acc_transmittance_kernel(dist_ref, dens_ref, mask_ref, out_ref, *, n_valid):
    d = dist_ref[...]          # (TM, N_pad) f32  sampled distances
    sigma = dens_ref[...]      # (TM, N_pad) f32  volume densities
    n_pad = d.shape[-1]

    # Right-neighbour differences along the lane axis: delta[i] = d[i+1] - d[i].
    d_next = pltpu.roll(d, shift=n_pad - 1, axis=1)   # d[(i+1) mod n_pad] at lane i
    lane = lax.broadcasted_iota(jnp.int32, d.shape, 1)

    # Zero the roll-wrap lane and every Pallas-padded lane (>= n_valid): under
    # the exclusive cumsum none of them can reach a kept output, and zeroing
    # keeps any stale-VMEM garbage (NaN/Inf) out of the MXU accumulation.
    prod = jnp.where(lane < n_valid - 1, (d_next - d) * sigma, 0.0)

    # Exclusive prefix sum on the MXU:  mask[j, i] = 1 iff j < i, so
    #   excl[r, i] = sum_{j < i} prod[r, j]
    excl = jnp.dot(prod, mask_ref[...], preferred_element_type=jnp.float32)

    # result[r, 0] = exp(0) = 1,  result[r, i] = exp(-cumsum[r, i-1]) for i >= 1
    out_ref[...] = jnp.exp(-excl)


def accumulated_transmittance(sampled_distances, volume_density, *, block_rays=512):
    """Pallas equivalent of AccumulatedTransmittanceApproximation.forward.

    Accepts (N,) float (single ray, original module signature) or (B, N) float
    (batched rays).  Returns the same shape.
    """
    squeeze = sampled_distances.ndim == 1
    if squeeze:
        sampled_distances = sampled_distances[None, :]
        volume_density = volume_density[None, :]
    assert sampled_distances.shape == volume_density.shape
    assert sampled_distances.ndim == 2
    b, n = sampled_distances.shape
    assert n >= 2

    d = sampled_distances.astype(jnp.float32)
    s = volume_density.astype(jnp.float32)

    # Lane-dense block width; the true sample axis is handled by Pallas'
    # ragged block (no host pad, no output slice).
    n_pad = _round_up(n, 128)

    # Ray tile: as large as the budget allows, multiple of 8, and capped so the
    # grid keeps >= 2 steps (both v7x TensorCores) whenever b is large enough.
    block_rays = max(8, _round_up(block_rays, 8))
    tm = min(block_rays, _round_up(b, 8))
    if b >= 16:
        tm = min(tm, _round_up(-(-b // 2), 8))
    while tm > 8 and _tile_vmem_bytes(tm, n_pad) > _TILE_VMEM_BUDGET:
        tm = max(8, _round_up(tm // 2, 8))

    # Exclusive-cumsum mask: mask[j, i] = 1 iff j < i (strictly upper
    # triangular).  f32 keeps the accumulated optical depth at full precision.
    excl_mask = (jnp.arange(n_pad)[:, None] < jnp.arange(n_pad)[None, :]
                 ).astype(jnp.float32)

    kernel = functools.partial(_acc_transmittance_kernel, n_valid=n)

    out = pl.pallas_call(
        kernel,
        out_shape=jax.ShapeDtypeStruct((b, n), jnp.float32),
        grid=(pl.cdiv(b, tm),),
        in_specs=[
            pl.BlockSpec((tm, n_pad), lambda i: (i, 0)),
            pl.BlockSpec((tm, n_pad), lambda i: (i, 0)),
            pl.BlockSpec((n_pad, n_pad), lambda i: (0, 0)),  # VMEM-resident mask
        ],
        out_specs=pl.BlockSpec((tm, n_pad), lambda i: (i, 0)),
        compiler_params=pltpu.CompilerParams(
            dimension_semantics=("parallel",),
            vmem_limit_bytes=_VMEM_LIMIT_BYTES),
    )(d, s, excl_mask)

    return out[0] if squeeze else out


def _reference(d, sigma):
    # Pure-JAX (f32) reference of the intended (NeRF, exclusive-cumsum) semantics.
    nd = jnp.concatenate(
        [d[..., 1:] - d[..., :-1], jnp.abs(d[..., -1:] - d[..., -2:-1])], axis=-1)
    prod = nd * sigma
    cs = jnp.cumsum(prod, axis=-1)
    return jnp.concatenate(
        [jnp.ones_like(d[..., :1]), jnp.exp(-cs[..., :-1])], axis=-1)


def _make_inputs(key, num_rays, num_samples, near=0.1, far=4.0):
    k_d, k_s = jax.random.split(key)
    d = jnp.sort(
        jax.random.uniform(k_d, (num_rays, num_samples), jnp.float32,
                           minval=near, maxval=far), axis=-1)
    s = jax.random.uniform(k_s, (num_rays, num_samples), jnp.float32,
                           minval=0.0, maxval=2.0)
    return d, s


if __name__ == "__main__":
    key = jax.random.PRNGKey(0)
    k1, k2 = jax.random.split(key)

    # Case 1: small shapes, deliberately non-multiples of (8, 128) — exercises
    # ragged blocks on both the ray and sample axes.
    d1, s1 = _make_inputs(k1, 6, 100)
    out1 = jax.block_until_ready(accumulated_transmittance(d1, s1))
    ref1 = _reference(d1, s1)
    assert out1.shape == (6, 100)
    assert jnp.allclose(out1, ref1, rtol=2e-2, atol=1e-3), "case 1 mismatch"

    # Case 2: multi-step grid with a ragged last ray tile (2 grid steps).
    d2, s2 = _make_inputs(k2, 520, 192)
    out2 = jax.block_until_ready(accumulated_transmittance(d2, s2))
    ref2 = _reference(d2, s2)
    assert out2.shape == (520, 192)
    assert jnp.allclose(out2, ref2, rtol=2e-2, atol=1e-3), "case 2 mismatch"

    # Case 3: single-ray path (original module signature).
    out3 = jax.block_until_ready(accumulated_transmittance(d1[0], s1[0]))
    assert out3.shape == (100,)
    assert jnp.allclose(out3, ref1[0], rtol=2e-2, atol=1e-3), "1-D mismatch"

    print("KERNEL_OK")
</pallas_src>

<mosaic_0001>
module attributes {stable_mosaic.version = 11 : i64} {
  func.func @_acc_transmittance_kernel(%arg0: i32, %arg1: memref<8x128xf32, #tpu.memory_space<vmem>>, %arg2: memref<8x128xf32, #tpu.memory_space<vmem>>, %arg3: memref<128x128xf32, #tpu.memory_space<vmem>>, %arg4: memref<8x128xf32, #tpu.memory_space<vmem>>) attributes {dimension_semantics = [#tpu.dimension_semantics<parallel>], iteration_bounds = array<i64: 1>, scalar_prefetch = 0 : i64, scratch_operands = 0 : i64, tpu.core_type = #tpu.core_type<tc>, window_params = [{transform_indices = @transform_0, window_bounds = array<i64: 8, 128>}, {transform_indices = @transform_1, window_bounds = array<i64: 8, 128>}, {pipeline_mode = #tpu.pipeline_mode<synchronous>, transform_indices = @transform_2, window_bounds = array<i64: 128, 128>}, {transform_indices = @transform_3, window_bounds = array<i64: 8, 128>}]} {
    %c0 = arith.constant 0 : index
    %c0_0 = arith.constant 0 : index
    %0 = vector.load %arg1[%c0, %c0_0] : memref<8x128xf32, #tpu.memory_space<vmem>>, vector<8x128xf32>
    %c0_1 = arith.constant 0 : index
    %c0_2 = arith.constant 0 : index
    %1 = vector.load %arg2[%c0_1, %c0_2] : memref<8x128xf32, #tpu.memory_space<vmem>>, vector<8x128xf32>
    %c127_i32 = arith.constant 127 : i32
    %2 = tpu.dynamic_rotate %0 by %c127_i32 dim 1 : vector<8x128xf32>, i32 -> vector<8x128xf32>
    %3 = tpu.iota {dimensions = array<i32: 1>} : vector<8x128xi32>
    %c99_i32 = arith.constant 99 : i32
    %4 = vector.broadcast %c99_i32 : i32 to vector<8x128xi32>
    %5 = arith.cmpi slt, %3, %4 : vector<8x128xi32>
    %6 = arith.subf %2, %0 : vector<8x128xf32>
    %7 = arith.mulf %6, %1 : vector<8x128xf32>
    %cst = arith.constant 0.000000e+00 : f32
    %8 = vector.broadcast %cst : f32 to vector<8x128xf32>
    %9 = arith.select %5, %7, %8 : vector<8x128xi1>, vector<8x128xf32>
    %c0_3 = arith.constant 0 : index
    %c0_4 = arith.constant 0 : index
    %10 = vector.load %arg3[%c0_3, %c0_4] : memref<128x128xf32, #tpu.memory_space<vmem>>, vector<128x128xf32>
    %cst_5 = arith.constant dense<0.000000e+00> : vector<8x128xf32>
    %11 = tpu.matmul %9, %10, %cst_5 {dimension_numbers = #tpu.dot_dimension_numbers<[1], [0], [0], [1], [0, 0, 1, 1], [], []>} : vector<8x128xf32>, vector<128x128xf32>, vector<8x128xf32> -> vector<8x128xf32>
    %cst_6 = arith.constant 0.000000e+00 : f32
    %12 = vector.broadcast %cst_6 : f32 to vector<8x128xf32>
    %13 = arith.subf %12, %11 : vector<8x128xf32>
    %14 = math.exp %13 : vector<8x128xf32>
    %c0_7 = arith.constant 0 : index
    %c0_8 = arith.constant 0 : index
    %15 = vector.load %arg4[%c0_7, %c0_8] : memref<8x128xf32, #tpu.memory_space<vmem>>, vector<8x128xf32>
    tpu.vector_store %arg4[%c0_7, %c0_8], %14 {strides = array<i32>} : memref<8x128xf32, #tpu.memory_space<vmem>>, vector<8x128xf32>,
    return
  }
  func.func @transform_0(%arg0: i32) -> (i32, i32) {
    %c0_i32 = arith.constant 0 : i32
    %c0_i32_0 = arith.constant 0 : i32
    return %arg0, %c0_i32 : i32, i32
  }
  func.func @transform_1(%arg0: i32) -> (i32, i32) {
    %c0_i32 = arith.constant 0 : i32
    %c0_i32_0 = arith.constant 0 : i32
    return %arg0, %c0_i32 : i32, i32
  }
  func.func @transform_2(%arg0: i32) -> (i32, i32) {
    %c0_i32 = arith.constant 0 : i32
    %c0_i32_0 = arith.constant 0 : i32
    %c0_i32_1 = arith.constant 0 : i32
    return %c0_i32, %c0_i32_0 : i32, i32
  }
  func.func @transform_3(%arg0: i32) -> (i32, i32) {
    %c0_i32 = arith.constant 0 : i32
    %c0_i32_0 = arith.constant 0 : i32
    return %arg0, %c0_i32 : i32, i32
  }
}

</mosaic_0001>

<bundles_post_ra>
// kernel: tpu_custom_call.1
= control target key start
LH: loop header
LB: loop body
LE: loop exit
PB: predicated region body
PF: predicated region fallthrough
CT: control target
= control target key end

     0   :  { %8 = vsyncpa [#allocation3], 0  ;;  %s277_s0 = inlined_call_operand.hbm [shape: f32[6,100], index: 0, kind: input, shape index: {}]   ;;  %s278_s1 = inlined_call_operand.hbm [shape: f32[6,100], index: 1, kind: input, shape index: {}]   ;;  %s279_s2 = inlined_call_operand.hbm [shape: f32[128,128], index: 2, kind: input, shape index: {}]   ;;  %s280_s3 = inlined_call_operand.hbm [shape: f32[6,100], index: 3, kind: output, shape index: {}]  }
   0x1   :  { %9 = vsyncpa [#allocation6], 0  ;;  %s27_s14 = sshll.u32 %s278_s1, 4  ;;  %s28_s14 = int_to_ptr.hbm [resolvable:$true] %s27_s14 }
   0x2   :  { %10 = vsyncpa [#allocation4], 0  ;;  %s238_s15 = smov [#allocation5]   ;;  %s16_s19 = sshll.u32 %s277_s0, 4  ;;  %s17_s19 = int_to_ptr.hbm [resolvable:$true] %s16_s19 }
   0x3   :  { %s29_s16 = sshll.u32 %s238_s15, 4  ;;  %s239_s20 = smov [#allocation2]   ;;  %s30_s16 = int_to_ptr.vmem [resolvable:$true] %s29_s16 }
   0x4   :  { %32 = dma.hbm_to_vmem [thread:$0]  %s28_s14, 128, %s30_s16, [#allocation6]  }
   0x5   :  { %s18_s21 = sshll.u32 %s239_s20, 4  ;;  %s37_s24 = sshll.u32 %s279_s2, 4  ;;  %s19_s21 = int_to_ptr.vmem [resolvable:$true] %s18_s21  ;;  %s38_s24 = int_to_ptr.hbm [resolvable:$true] %s37_s24 }
   0x6   :  { %21 = dma.hbm_to_vmem [thread:$0]  %s17_s19, 128, %s19_s21, [#allocation3]  }
   0x7   :  { %s240_s1 = smov [#allocation7]   ;;  %s241_s26 = smov 128  }
   0x8   :  { %s39_s25 = sshll.u32 %s240_s1, 4  ;;  %s242_s27 = smov 8   ;;  %s40_s25 = int_to_ptr.vmem [resolvable:$true] %s39_s25 }
   0x9   :  { %45 = dma.hbm_to_vmem [thread:$0]  %s38_s24, 2048, %s40_s25, [#allocation6], %s241_s26, %s241_s26, %s242_s27  }
   0xa   :  { %232 = dma.done.wait [#allocation3], 128  }
   0xb   :  { %233 = vsyncadd [#allocation3], 4294967168 }
   0xc   :  { %234 = dma.done.wait [#allocation6], 2176  }
   0xd   :  { %235 = vsyncadd [#allocation6], 4294965120  ;;  %v58_v0 = vld [vmem:[#allocation2] sm:$0xff]  ;;  %v83_v1 = vld [vmem:[#allocation7 + $0x78] sm:$0xff]  ;;  %s243_s0 = smov 127   ;;  %v62_v17 = vlaneseq  ;;  %s244_s2 = smov [#allocation8]  }
   0xe   :  { %v82_v2 = vld [vmem:[#allocation7 + $0x70] sm:$0xff]  ;;  %60 = vrot.lane.b32.xlu0 %v58_v0, %s243_s0  ;;  %84 = vmatpush.msra.mxu0 %v83_v1  ;;  %v81_v3 = vld [vmem:[#allocation7 + $0x68] sm:$0xff]  ;;  %v80_v4 = vld [vmem:[#allocation7 + $0x60] sm:$0xff]  ;;  %s113_s28 = sshll.u32 %s244_s2, 4  ;;  %s115_s4 = sshll.u32 %s280_s3, 4  ;;  %s114_s28 = int_to_ptr.vmem [resolvable:$true] %s113_s28  ;;  %s116_s4 = int_to_ptr.hbm [resolvable:$true] %s115_s4 }
   0xf   :  { %v79_v5 = vld [vmem:[#allocation7 + $0x58] sm:$0xff]  ;;  %v78_v6 = vld [vmem:[#allocation7 + $0x50] sm:$0xff]  ;;  %v77_v7 = vld [vmem:[#allocation7 + $0x48] sm:$0xff]  ;;  %v63_v18 = vand.u32 127, %v62_v17 }
  0x10   :  { %85 = vmatpush.msra.mxu0 %v82_v2  ;;  %v76_v8 = vld [vmem:[#allocation7 + $0x40] sm:$0xff]  ;;  %v75_v9 = vld [vmem:[#allocation7 + $0x38] sm:$0xff]  ;;  %v74_v10 = vld [vmem:[#allocation7 + $0x30] sm:$0xff] }
  0x11   :  { %v73_v11 = vld [vmem:[#allocation7 + $0x28] sm:$0xff]  ;;  %v72_v12 = vld [vmem:[#allocation7 + $0x20] sm:$0xff]  ;;  %v71_v13 = vld [vmem:[#allocation7 + $0x18] sm:$0xff]  ;;  %vm64_vm0 = vcmp.lt.s32.totalorder %v63_v18, 99 }
  0x12   :  { %86 = vmatpush.msra.mxu0 %v81_v3  ;;  %v70_v14 = vld [vmem:[#allocation7 + $0x10] sm:$0xff]  ;;  %v69_v15 = vld [vmem:[#allocation7 + $0x8] sm:$0xff]  ;;  %v68_v16 = vld [vmem:[#allocation7] sm:$0xff] }
  0x13   :  { %v59_v19 = vld [vmem:[#allocation5] sm:$0xff] }
  0x14   :  { %87 = vmatpush.msra.mxu0 %v80_v4 }
  0x16   :  { %88 = vmatpush.msra.mxu0 %v79_v5 }
  0x18   :  { %89 = vmatpush.msra.mxu0 %v78_v6 }
  0x1a   :  { %90 = vmatpush.msra.mxu0 %v77_v7 }
  0x1c   :  { %91 = vmatpush.msra.mxu0 %v76_v8 }
  0x1e   :  { %92 = vmatpush.msra.mxu0 %v75_v9 }
  0x20   :  { %93 = vmatpush.msra.mxu0 %v74_v10 }
  0x22   :  { %94 = vmatpush.msra.mxu0 %v73_v11 }
  0x24   :  { %95 = vmatpush.msra.mxu0 %v72_v12 }
  0x26   :  { %96 = vmatpush.msra.mxu0 %v71_v13 }
  0x28   :  { %97 = vmatpush.msra.mxu0 %v70_v14 }
  0x2a   :  { %98 = vmatpush.msra.mxu0 %v69_v15 }
  0x2c   :  { %99 = vmatpush.msra.mxu0 %v68_v16 }
  0x80   :  { %v61_v20 = vpop.permute.xlu0 %60 }
  0x81   :  { %v65_v21 = vsub.f32 %v61_v20, %v58_v0 }
  0x83   :  { %v66_v22 = vmul.f32 %v65_v21, %v59_v19 }
  0x85   :  { %126 = vmatmul.msk.f32.vlgmr.msra.gmra.mxu0 %vm64_vm0, %v66_v22 }
 0x102   :  { %v101_v23 = vpop.f32.mrf.mxu0 }
 0x103   :  { %v104_v24 = vsub.f32 0.0, %v101_v23 }
 0x105   :  { %v105_v25 = vmul.f32 1.442695, %v104_v24 }
 0x107   :  { %134 = vpow2.f32 %v105_v25 }
 0x10d   :  { %v135_v26 = vpop.eup %134 }
 0x10e   :  { %107 = vst [vmem:[#allocation8] sm:$0xff] %v135_v26 }
 0x10f   :  { %118 = dma.vmem_to_hbm [thread:$0]  %s114_s28, 128, %s116_s4, [#allocation4]  }
 0x110   :  { %236 = dma.done.wait [#allocation4], 128  }
 0x111   :  { %237 = vsyncadd [#allocation4], 4294967168 }
 0x112   :  { %123 = vsyncpa [#allocation3], 1 }
 0x113   :  { %124 = vsyncpa [#allocation6], 1 }
 0x114   :  { %125 = vsyncpa [#allocation4], 1 }

</bundles_post_ra>
